<compile_context>
chip_gen: v7x
topology: tpu7x:2x2x1
jax: 0.10.0
libtpu: 0.0.40
codegen_flags: <defaults>
</compile_context>

<pallas_src>
import functools

import jax
import jax.numpy as jnp
import numpy as np
from jax.experimental import pallas as pl
from jax.experimental.pallas import tpu as pltpu


def _pos_attn_kernel(xq_ref, xkv_ref, mt_ref, r_ref, wv_ref, bv_ref, gamma_ref,
                     out_ref, a_ref, acc_ref, m_ref, l_ref, *, compute_dtype):
    """One grid step (b, i, j): query tile i against key/value tile j."""
    j = pl.program_id(2)

    @pl.when(j == 0)
    def _init():
        # Effective query a = Mt @ x_q + r  (Mt = Wk^T Wq, r = Wk^T bq).
        # energy[i, j] = q_i . k_j == a_i . x_j up to per-row constants that
        # cancel in the softmax over j (in particular bk drops out entirely).
        xq_c = xq_ref[...].astype(compute_dtype)                       # (C, Tq)
        a = jax.lax.dot_general(
            mt_ref[...], xq_c, (((1,), (0,)), ((), ())),
            preferred_element_type=jnp.float32) + r_ref[...]           # (C, Tq) f32
        a_ref[...] = a.astype(compute_dtype)
        acc_ref[...] = jnp.zeros_like(acc_ref)
        m_ref[...] = jnp.full_like(m_ref, -jnp.inf)
        l_ref[...] = jnp.zeros_like(l_ref)

    xk = xkv_ref[...]                                                  # (C, Tk)

    # energy^T[k, q] = sum_c x_k[c, k] * a[c, q]  -> (Tk, Tq), f32 accumulate.
    e_t = jax.lax.dot_general(
        xk, a_ref[...], (((0,), (0,)), ((), ())),
        preferred_element_type=jnp.float32)

    # Online softmax over the key axis (axis 0 of e_t); stats are (1, Tq).
    m_prev = m_ref[...]
    m_new = jnp.maximum(m_prev, jnp.max(e_t, axis=0, keepdims=True))
    alpha = jnp.exp(m_prev - m_new)
    p = jnp.exp(e_t - m_new)                                           # (Tk, Tq) f32
    l_ref[...] = alpha * l_ref[...] + jnp.sum(p, axis=0, keepdims=True)
    m_ref[...] = m_new

    # Value 1x1 conv on this key tile: v = Wv @ x_k + bv.
    v = jax.lax.dot_general(
        wv_ref[...], xk, (((1,), (0,)), ((), ())),
        preferred_element_type=jnp.float32) + bv_ref[...]              # (C, Tk) f32

    # acc[c, q] <- alpha * acc[c, q] + sum_k v[c, k] * p[k, q]
    pv = jax.lax.dot_general(
        v.astype(compute_dtype), p.astype(compute_dtype),
        (((1,), (0,)), ((), ())),
        preferred_element_type=jnp.float32)                            # (C, Tq) f32
    acc_ref[...] = alpha * acc_ref[...] + pv

    @pl.when(j == pl.num_programs(2) - 1)
    def _finalize():
        # Exact reciprocal: it runs once per (C, Tq) output tile so its cost is
        # negligible; approx=True (EUP vrcp) is available but exact keeps the
        # f32 path within 1e-4 of the reference.
        inv_l = pl.reciprocal(l_ref[...], approx=False)                # (1, Tq)
        gamma = gamma_ref[0, 0]
        out_ref[...] = (gamma * (acc_ref[...] * inv_l)
                        + xq_ref[...]).astype(out_ref.dtype)


def _pick_tile(n):
    for t in (512, 256, 128):
        if n % t == 0:
            return t
    return n


def danet_position_attention(x_nchw, wq, bq, wk, bk, wv, bv, gamma, *,
                             tq=None, tk=None, compute_dtype=jnp.bfloat16):
    """DANet position-attention forward.

    x_nchw: (B, C, H, W) float32; wq, wk: (C//8, C); wv: (C, C) (PyTorch
    1x1-conv layout); biases 1-D; gamma scalar.  Returns (B, C, H, W).
    """
    del bk  # the key bias cancels under softmax over the key axis
    B, C, H, W = x_nchw.shape
    N = H * W

    tq = tq if tq is not None else _pick_tile(N)
    tk = tk if tk is not None else _pick_tile(N)
    assert N % tq == 0 and N % tk == 0, (N, tq, tk)

    hi = jax.lax.Precision.HIGHEST
    x_cn = x_nchw.reshape(B, C, N)                    # free reshape (no transpose)
    x_kv = x_cn.astype(compute_dtype)                 # streamed key/value source

    mt = jnp.dot(wk.T, wq, precision=hi).astype(compute_dtype)            # (C, C)
    r = jnp.dot(bq, wk, precision=hi).reshape(C, 1).astype(jnp.float32)   # (C, 1)
    wv_m = wv.astype(compute_dtype)                                       # (C, C)
    bv_c = bv.reshape(C, 1).astype(jnp.float32)                           # (C, 1)
    gamma_s = jnp.asarray(gamma, jnp.float32).reshape(1, 1)

    kernel = functools.partial(_pos_attn_kernel, compute_dtype=compute_dtype)

    out_cn = pl.pallas_call(
        kernel,
        out_shape=jax.ShapeDtypeStruct((B, C, N), x_nchw.dtype),
        grid_spec=pltpu.PrefetchScalarGridSpec(
            num_scalar_prefetch=0,
            grid=(B, N // tq, N // tk),
            in_specs=[
                # f32 x tile of the current query block (also the residual);
                # index map constant over j -> fetched once per (b, i).
                pl.BlockSpec((None, C, tq), lambda b, i, j: (b, 0, i)),
                # compute-dtype x tile of the current key/value block.
                pl.BlockSpec((None, C, tk), lambda b, i, j: (b, 0, j)),
                pl.BlockSpec((C, C), lambda b, i, j: (0, 0)),        # Mt = Wk^T Wq
                pl.BlockSpec((C, 1), lambda b, i, j: (0, 0)),        # r  = Wk^T bq
                pl.BlockSpec((C, C), lambda b, i, j: (0, 0)),        # Wv
                pl.BlockSpec((C, 1), lambda b, i, j: (0, 0)),        # bv
                pl.BlockSpec(memory_space=pltpu.MemorySpace.SMEM),   # gamma (1,1)
            ],
            out_specs=pl.BlockSpec((None, C, tq), lambda b, i, j: (b, 0, i)),
            scratch_shapes=[
                pltpu.VMEM((C, tq), compute_dtype),   # a: effective query tile
                pltpu.VMEM((C, tq), jnp.float32),     # output accumulator
                pltpu.VMEM((1, tq), jnp.float32),     # running max
                pltpu.VMEM((1, tq), jnp.float32),     # running denominator
            ],
        ),
        compiler_params=pltpu.CompilerParams(
            # batch and query-tile axes are independent -> shard across
            # TensorCores (matters on v7x's 2 TCs even when B is small); the
            # key-tile axis is the softmax reduction -> 'arbitrary', innermost.
            dimension_semantics=("parallel", "parallel", "arbitrary"),
            # Explicit budget: tiles are O(C*(Tq+Tk)); 32 MiB is ample up to
            # C=1024 at Tq=Tk=512 and stays well inside v7x's 64 MiB VMEM.
            vmem_limit_bytes=32 * 1024 * 1024,
        ),
    )(x_cn, x_kv, mt, r, wv_m, bv_c, gamma_s)

    return out_cn.reshape(B, C, H, W)


def _reference(x_nchw, wq, bq, wk, bk, wv, bv, gamma):
    """Plain-JAX reference mirroring the PyTorch forward exactly (f32)."""
    B, C, H, W = x_nchw.shape
    N = H * W
    hi = jax.lax.Precision.HIGHEST
    xf = x_nchw.reshape(B, C, N)
    q = jnp.einsum('oc,bcn->bon', wq, xf, precision=hi) + bq[None, :, None]
    k = jnp.einsum('oc,bcn->bon', wk, xf, precision=hi) + bk[None, :, None]
    v = jnp.einsum('oc,bcn->bon', wv, xf, precision=hi) + bv[None, :, None]
    energy = jnp.einsum('bon,bom->bnm', q, k, precision=hi)        # (B, N, N)
    attn = jax.nn.softmax(energy, axis=-1)
    out = jnp.einsum('bcm,bnm->bcn', v, attn, precision=hi)        # (B, C, N)
    return gamma * out.reshape(B, C, H, W) + x_nchw


if __name__ == "__main__":
    B, C, H, W = 2, 16, 16, 16          # in_dim = 16 -> query/key channels = 2
    C8 = C // 8

    key = jax.random.PRNGKey(0)
    kx, kq, kbq, kk, kbk, kv, kbv = jax.random.split(key, 7)

    x = jax.random.normal(kx, (B, C, H, W), dtype=jnp.float32)
    wq = jax.random.normal(kq, (C8, C), dtype=jnp.float32) * 0.1
    bq = jax.random.normal(kbq, (C8,), dtype=jnp.float32) * 0.1
    wk = jax.random.normal(kk, (C8, C), dtype=jnp.float32) * 0.1
    bk = jax.random.normal(kbk, (C8,), dtype=jnp.float32) * 0.1
    wv = jax.random.normal(kv, (C, C), dtype=jnp.float32) * 0.1
    bv = jax.random.normal(kbv, (C,), dtype=jnp.float32) * 0.1
    # nn.Parameter(torch.zeros(1)) initializes gamma to 0; use a nonzero value
    # here so the attention path is actually exercised.
    gamma = jnp.float32(0.5)

    ref = jax.block_until_ready(_reference(x, wq, bq, wk, bk, wv, bv, gamma))

    # f32 compute path: strict check (online softmax + folding are exact).
    out_f32 = jax.block_until_ready(
        danet_position_attention(x, wq, bq, wk, bk, wv, bv, gamma,
                                 tq=128, tk=128, compute_dtype=jnp.float32))
    np.testing.assert_allclose(np.asarray(out_f32), np.asarray(ref),
                               rtol=1e-4, atol=1e-4)

    # bf16 MXU path (production default): looser tolerance for bf16 operands.
    out_bf16 = jax.block_until_ready(
        danet_position_attention(x, wq, bq, wk, bk, wv, bv, gamma,
                                 tq=128, tk=128, compute_dtype=jnp.bfloat16))
    np.testing.assert_allclose(np.asarray(out_bf16), np.asarray(ref),
                               rtol=2e-2, atol=2e-2)

    print("KERNEL_OK")
</pallas_src>

<mosaic_0001>
module attributes {stable_mosaic.version = 11 : i64} {
  func.func @_pos_attn_kernel(%arg0: i32, %arg1: i32, %arg2: i32, %arg3: memref<1x16x128xf32, #tpu.memory_space<vmem>>, %arg4: memref<1x16x128xf32, #tpu.memory_space<vmem>>, %arg5: memref<16x16xf32, #tpu.memory_space<vmem>>, %arg6: memref<16x1xf32, #tpu.memory_space<vmem>>, %arg7: memref<16x16xf32, #tpu.memory_space<vmem>>, %arg8: memref<16x1xf32, #tpu.memory_space<vmem>>, %arg9: memref<1x1xf32, #tpu.memory_space<smem>>, %arg10: memref<1x16x128xf32, #tpu.memory_space<vmem>>, %arg11: memref<16x128xf32, #tpu.memory_space<vmem>>, %arg12: memref<16x128xf32, #tpu.memory_space<vmem>>, %arg13: memref<1x128xf32, #tpu.memory_space<vmem>>, %arg14: memref<1x128xf32, #tpu.memory_space<vmem>>) attributes {dimension_semantics = [#tpu.dimension_semantics<parallel>, #tpu.dimension_semantics<parallel>, #tpu.dimension_semantics<arbitrary>], iteration_bounds = array<i64: 2, 2, 2>, scalar_prefetch = 0 : i64, scratch_operands = 4 : i64, tpu.core_type = #tpu.core_type<tc>, window_params = [{transform_indices = @transform_0, window_bounds = array<i64: 1, 16, 128>}, {transform_indices = @transform_1, window_bounds = array<i64: 1, 16, 128>}, {pipeline_mode = #tpu.pipeline_mode<synchronous>, transform_indices = @transform_2, window_bounds = array<i64: 16, 16>}, {pipeline_mode = #tpu.pipeline_mode<synchronous>, transform_indices = @transform_3, window_bounds = array<i64: 16, 1>}, {pipeline_mode = #tpu.pipeline_mode<synchronous>, transform_indices = @transform_4, window_bounds = array<i64: 16, 16>}, {pipeline_mode = #tpu.pipeline_mode<synchronous>, transform_indices = @transform_5, window_bounds = array<i64: 16, 1>}, {transform_indices = @transform_6, window_bounds = array<i64: 1, 1>}, {transform_indices = @transform_7, window_bounds = array<i64: 1, 16, 128>}]} {
    %c0_i32 = arith.constant 0 : i32
    %0 = arith.cmpi eq, %arg2, %c0_i32 : i32
    %1 = arith.extui %0 : i1 to i32
    %c0_i32_0 = arith.constant 0 : i32
    %2 = arith.cmpi ne, %1, %c0_i32_0 : i32
    scf.if %2 {
      %c0_26 = arith.constant 0 : index
      %c0_27 = arith.constant 0 : index
      %c0_28 = arith.constant 0 : index
      %37 = vector.load %arg3[%c0_26, %c0_27, %c0_28] : memref<1x16x128xf32, #tpu.memory_space<vmem>>, vector<1x16x128xf32>
      %38 = vector.shape_cast %37 : vector<1x16x128xf32> to vector<16x128xf32>
      %c0_29 = arith.constant 0 : index
      %c0_30 = arith.constant 0 : index
      %39 = vector.load %arg5[%c0_29, %c0_30] : memref<16x16xf32, #tpu.memory_space<vmem>>, vector<16x16xf32>
      %cst_31 = arith.constant dense<0.000000e+00> : vector<16x128xf32>
      %40 = tpu.matmul %39, %38, %cst_31 {dimension_numbers = #tpu.dot_dimension_numbers<[1], [0], [0], [1], [0, 0, 1, 1], [], []>} : vector<16x16xf32>, vector<16x128xf32>, vector<16x128xf32> -> vector<16x128xf32>
      %c0_32 = arith.constant 0 : index
      %c0_33 = arith.constant 0 : index
      %41 = vector.load %arg6[%c0_32, %c0_33] : memref<16x1xf32, #tpu.memory_space<vmem>>, vector<16x1xf32>
      %42 = vector.broadcast %41 : vector<16x1xf32> to vector<16x128xf32>
      %43 = arith.addf %40, %42 : vector<16x128xf32>
      %c0_34 = arith.constant 0 : index
      %c0_35 = arith.constant 0 : index
      %44 = vector.load %arg11[%c0_34, %c0_35] : memref<16x128xf32, #tpu.memory_space<vmem>>, vector<16x128xf32>
      tpu.vector_store %arg11[%c0_34, %c0_35], %43 {strides = array<i32>} : memref<16x128xf32, #tpu.memory_space<vmem>>, vector<16x128xf32>,
      %cst_36 = arith.constant 0.000000e+00 : f32
      %45 = vector.broadcast %cst_36 : f32 to vector<16x128xf32>
      %c0_37 = arith.constant 0 : index
      %c0_38 = arith.constant 0 : index
      %46 = vector.load %arg12[%c0_37, %c0_38] : memref<16x128xf32, #tpu.memory_space<vmem>>, vector<16x128xf32>
      tpu.vector_store %arg12[%c0_37, %c0_38], %45 {strides = array<i32>} : memref<16x128xf32, #tpu.memory_space<vmem>>, vector<16x128xf32>,
      %cst_39 = arith.constant 0xFF800000 : f32
      %47 = vector.broadcast %cst_39 : f32 to vector<1x128xf32>
      %c0_40 = arith.constant 0 : index
      %c0_41 = arith.constant 0 : index
      %48 = vector.load %arg13[%c0_40, %c0_41] : memref<1x128xf32, #tpu.memory_space<vmem>>, vector<1x128xf32>
      tpu.vector_store %arg13[%c0_40, %c0_41], %47 {strides = array<i32>} : memref<1x128xf32, #tpu.memory_space<vmem>>, vector<1x128xf32>,
      %cst_42 = arith.constant 0.000000e+00 : f32
      %49 = vector.broadcast %cst_42 : f32 to vector<1x128xf32>
      %c0_43 = arith.constant 0 : index
      %c0_44 = arith.constant 0 : index
      %50 = vector.load %arg14[%c0_43, %c0_44] : memref<1x128xf32, #tpu.memory_space<vmem>>, vector<1x128xf32>
      tpu.vector_store %arg14[%c0_43, %c0_44], %49 {strides = array<i32>} : memref<1x128xf32, #tpu.memory_space<vmem>>, vector<1x128xf32>,
    } else {
    }
    %c0 = arith.constant 0 : index
    %c0_1 = arith.constant 0 : index
    %c0_2 = arith.constant 0 : index
    %3 = vector.load %arg4[%c0, %c0_1, %c0_2] : memref<1x16x128xf32, #tpu.memory_space<vmem>>, vector<1x16x128xf32>
    %4 = vector.shape_cast %3 : vector<1x16x128xf32> to vector<16x128xf32>
    %c0_3 = arith.constant 0 : index
    %c0_4 = arith.constant 0 : index
    %5 = vector.load %arg11[%c0_3, %c0_4] : memref<16x128xf32, #tpu.memory_space<vmem>>, vector<16x128xf32>
    %cst = arith.constant dense<0.000000e+00> : vector<128x128xf32>
    %6 = tpu.matmul %4, %5, %cst {dimension_numbers = #tpu.dot_dimension_numbers<[0], [0], [1], [1], [0, 1, 1, 1], [], []>} : vector<16x128xf32>, vector<16x128xf32>, vector<128x128xf32> -> vector<128x128xf32>
    %c0_5 = arith.constant 0 : index
    %c0_6 = arith.constant 0 : index
    %7 = vector.load %arg13[%c0_5, %c0_6] : memref<1x128xf32, #tpu.memory_space<vmem>>, vector<1x128xf32>
    %cst_7 = arith.constant dense<0xFF800000> : vector<128xf32>
    %8 = vector.multi_reduction <maximumf>, %6, %cst_7 [0] : vector<128x128xf32> to vector<128xf32>
    %9 = vector.shape_cast %8 : vector<128xf32> to vector<1x128xf32>
    %10 = arith.maximumf %7, %9 : vector<1x128xf32>
    %11 = arith.subf %7, %10 : vector<1x128xf32>
    %12 = math.exp %11 : vector<1x128xf32>
    %13 = vector.broadcast %10 : vector<1x128xf32> to vector<128x128xf32>
    %14 = arith.subf %6, %13 : vector<128x128xf32>
    %15 = math.exp %14 : vector<128x128xf32>
    %c0_8 = arith.constant 0 : index
    %c0_9 = arith.constant 0 : index
    %16 = vector.load %arg14[%c0_8, %c0_9] : memref<1x128xf32, #tpu.memory_space<vmem>>, vector<1x128xf32>
    %17 = arith.mulf %12, %16 : vector<1x128xf32>
    %cst_10 = arith.constant dense<0.000000e+00> : vector<128xf32>
    %18 = vector.multi_reduction <add>, %15, %cst_10 [0] : vector<128x128xf32> to vector<128xf32>
    %19 = vector.shape_cast %18 : vector<128xf32> to vector<1x128xf32>
    %20 = arith.addf %17, %19 : vector<1x128xf32>
    %c0_11 = arith.constant 0 : index
    %c0_12 = arith.constant 0 : index
    %21 = vector.load %arg14[%c0_11, %c0_12] : memref<1x128xf32, #tpu.memory_space<vmem>>, vector<1x128xf32>
    tpu.vector_store %arg14[%c0_11, %c0_12], %20 {strides = array<i32>} : memref<1x128xf32, #tpu.memory_space<vmem>>, vector<1x128xf32>,
    %c0_13 = arith.constant 0 : index
    %c0_14 = arith.constant 0 : index
    %22 = vector.load %arg13[%c0_13, %c0_14] : memref<1x128xf32, #tpu.memory_space<vmem>>, vector<1x128xf32>
    tpu.vector_store %arg13[%c0_13, %c0_14], %10 {strides = array<i32>} : memref<1x128xf32, #tpu.memory_space<vmem>>, vector<1x128xf32>,
    %c0_15 = arith.constant 0 : index
    %c0_16 = arith.constant 0 : index
    %23 = vector.load %arg7[%c0_15, %c0_16] : memref<16x16xf32, #tpu.memory_space<vmem>>, vector<16x16xf32>
    %cst_17 = arith.constant dense<0.000000e+00> : vector<16x128xf32>
    %24 = tpu.matmul %23, %4, %cst_17 {dimension_numbers = #tpu.dot_dimension_numbers<[1], [0], [0], [1], [0, 0, 1, 1], [], []>} : vector<16x16xf32>, vector<16x128xf32>, vector<16x128xf32> -> vector<16x128xf32>
    %c0_18 = arith.constant 0 : index
    %c0_19 = arith.constant 0 : index
    %25 = vector.load %arg8[%c0_18, %c0_19] : memref<16x1xf32, #tpu.memory_space<vmem>>, vector<16x1xf32>
    %26 = vector.broadcast %25 : vector<16x1xf32> to vector<16x128xf32>
    %27 = arith.addf %24, %26 : vector<16x128xf32>
    %cst_20 = arith.constant dense<0.000000e+00> : vector<16x128xf32>
    %28 = tpu.matmul %27, %15, %cst_20 {dimension_numbers = #tpu.dot_dimension_numbers<[1], [0], [0], [1], [0, 0, 1, 1], [], []>} : vector<16x128xf32>, vector<128x128xf32>, vector<16x128xf32> -> vector<16x128xf32>
    %c0_21 = arith.constant 0 : index
    %c0_22 = arith.constant 0 : index
    %29 = vector.load %arg12[%c0_21, %c0_22] : memref<16x128xf32, #tpu.memory_space<vmem>>, vector<16x128xf32>
    %30 = vector.broadcast %12 : vector<1x128xf32> to vector<16x128xf32>
    %31 = arith.mulf %30, %29 : vector<16x128xf32>
    %32 = arith.addf %31, %28 : vector<16x128xf32>
    %c0_23 = arith.constant 0 : index
    %c0_24 = arith.constant 0 : index
    %33 = vector.load %arg12[%c0_23, %c0_24] : memref<16x128xf32, #tpu.memory_space<vmem>>, vector<16x128xf32>
    tpu.vector_store %arg12[%c0_23, %c0_24], %32 {strides = array<i32>} : memref<16x128xf32, #tpu.memory_space<vmem>>, vector<16x128xf32>,
    %c1_i32 = arith.constant 1 : i32
    %34 = arith.cmpi eq, %arg2, %c1_i32 : i32
    %35 = arith.extui %34 : i1 to i32
    %c0_i32_25 = arith.constant 0 : i32
    %36 = arith.cmpi ne, %35, %c0_i32_25 : i32
    scf.if %36 {
      %c0_26 = arith.constant 0 : index
      %c0_27 = arith.constant 0 : index
      %37 = vector.load %arg14[%c0_26, %c0_27] : memref<1x128xf32, #tpu.memory_space<vmem>>, vector<1x128xf32>
      %38 = tpu.reciprocal %37 : vector<1x128xf32> -> vector<1x128xf32>
      %c0_28 = arith.constant 0 : index
      %c0_29 = arith.constant 0 : index
      %39 = memref.load %arg9[%c0_28, %c0_29] : memref<1x1xf32, #tpu.memory_space<smem>>
      %c0_30 = arith.constant 0 : index
      %c0_31 = arith.constant 0 : index
      %40 = vector.load %arg12[%c0_30, %c0_31] : memref<16x128xf32, #tpu.memory_space<vmem>>, vector<16x128xf32>
      %41 = vector.broadcast %38 : vector<1x128xf32> to vector<16x128xf32>
      %42 = arith.mulf %40, %41 : vector<16x128xf32>
      %43 = vector.broadcast %39 : f32 to vector<16x128xf32>
      %44 = arith.mulf %43, %42 : vector<16x128xf32>
      %c0_32 = arith.constant 0 : index
      %c0_33 = arith.constant 0 : index
      %c0_34 = arith.constant 0 : index
      %45 = vector.load %arg3[%c0_32, %c0_33, %c0_34] : memref<1x16x128xf32, #tpu.memory_space<vmem>>, vector<1x16x128xf32>
      %46 = vector.shape_cast %45 : vector<1x16x128xf32> to vector<16x128xf32>
      %47 = arith.addf %44, %46 : vector<16x128xf32>
      %c0_35 = arith.constant 0 : index
      %c0_36 = arith.constant 0 : index
      %c0_37 = arith.constant 0 : index
      %48 = vector.load %arg10[%c0_35, %c0_36, %c0_37] : memref<1x16x128xf32, #tpu.memory_space<vmem>>, vector<1x16x128xf32>
      %49 = vector.shape_cast %48 : vector<1x16x128xf32> to vector<16x128xf32>
      %50 = vector.shape_cast %47 : vector<16x128xf32> to vector<1x16x128xf32>
      tpu.vector_store %arg10[%c0_35, %c0_36, %c0_37], %50 {strides = array<i32>} : memref<1x16x128xf32, #tpu.memory_space<vmem>>, vector<1x16x128xf32>,
    } else {
    }
    return
  }
  func.func @transform_0(%arg0: i32, %arg1: i32, %arg2: i32) -> (i32, i32, i32) {
    %c0_i32 = arith.constant 0 : i32
    %c0_i32_0 = arith.constant 0 : i32
    return %arg0, %c0_i32, %arg1 : i32, i32, i32
  }
  func.func @transform_1(%arg0: i32, %arg1: i32, %arg2: i32) -> (i32, i32, i32) {
    %c0_i32 = arith.constant 0 : i32
    %c0_i32_0 = arith.constant 0 : i32
    return %arg0, %c0_i32, %arg2 : i32, i32, i32
  }
  func.func @transform_2(%arg0: i32, %arg1: i32, %arg2: i32) -> (i32, i32) {
    %c0_i32 = arith.constant 0 : i32
    %c0_i32_0 = arith.constant 0 : i32
    %c0_i32_1 = arith.constant 0 : i32
    return %c0_i32, %c0_i32_0 : i32, i32
  }
  func.func @transform_3(%arg0: i32, %arg1: i32, %arg2: i32) -> (i32, i32) {
    %c0_i32 = arith.constant 0 : i32
    %c0_i32_0 = arith.constant 0 : i32
    %c0_i32_1 = arith.constant 0 : i32
    return %c0_i32, %c0_i32_0 : i32, i32
  }
  func.func @transform_4(%arg0: i32, %arg1: i32, %arg2: i32) -> (i32, i32) {
    %c0_i32 = arith.constant 0 : i32
    %c0_i32_0 = arith.constant 0 : i32
    %c0_i32_1 = arith.constant 0 : i32
    return %c0_i32, %c0_i32_0 : i32, i32
  }
  func.func @transform_5(%arg0: i32, %arg1: i32, %arg2: i32) -> (i32, i32) {
    %c0_i32 = arith.constant 0 : i32
    %c0_i32_0 = arith.constant 0 : i32
    %c0_i32_1 = arith.constant 0 : i32
    return %c0_i32, %c0_i32_0 : i32, i32
  }
  func.func @transform_6(%arg0: i32, %arg1: i32, %arg2: i32) -> (i32, i32) {
    %c0_i32 = arith.constant 0 : i32
    %c0_i32_0 = arith.constant 0 : i32
    %c0_i32_1 = arith.constant 0 : i32
    return %c0_i32, %c0_i32_0 : i32, i32
  }
  func.func @transform_7(%arg0: i32, %arg1: i32, %arg2: i32) -> (i32, i32, i32) {
    %c0_i32 = arith.constant 0 : i32
    %c0_i32_0 = arith.constant 0 : i32
    return %arg0, %c0_i32, %arg1 : i32, i32, i32
  }
}

</mosaic_0001>

<bundles_post_ra>
// kernel: tpu_custom_call.1
= control target key start
LH: loop header
LB: loop body
LE: loop exit
PB: predicated region body
PF: predicated region fallthrough
CT: control target
= control target key end

     0   :  { %s2237_s0 = inlined_call_operand.hbm [shape: f32[2,16,256], index: 0, kind: input, shape index: {}]   ;;  %s2238_s1 = inlined_call_operand.hbm [shape: f32[2,16,256], index: 1, kind: input, shape index: {}]   ;;  %s2239_s2 = inlined_call_operand.vmem [shape: f32[16,16], index: 2, kind: input, shape index: {}]   ;;  %s2240_s3 = inlined_call_operand.vmem [shape: f32[16,1], index: 3, kind: input, shape index: {}]   ;;  %s2241_s4 = inlined_call_operand.vmem [shape: f32[16,16], index: 4, kind: input, shape index: {}]   ;;  %s2242_s5 = inlined_call_operand.vmem [shape: f32[16,1], index: 5, kind: input, shape index: {}]   ;;  %s2243_s6 = inlined_call_operand.<no memory space> [shape: f32[1,1], index: 6, kind: input, shape index: {}]   ;;  %s2244_s7 = inlined_call_operand.hbm [shape: f32[2,16,256], index: 7, kind: output, shape index: {}]  }
   0x1   :  { %2262 = sst [smem:[#allocation25_spill]] %s2237_s0 }
   0x2   :  { %2263 = sst [smem:[#allocation26_spill]] %s2244_s7 }
   0x3   :  { %12 = sst [smem:[#allocation6]] %s2243_s6 }
   0x4   :  { %13 = vsyncpa [#allocation8], 0 }
   0x5   :  { %15 = vsyncpa [#allocation8 + $0x1], 0 }
   0x6   :  { %16 = vsyncpa [#allocation11], 0 }
   0x7   :  { %18 = vsyncpa [#allocation11 + $0x1], 0 }
   0x8   :  { %19 = vsyncpa [#allocation9], 0 }
   0x9   :  { %21 = vsyncpa [#allocation9 + $0x1], 0  ;;  %s1792_s26 = smov 0   ;;  %s1794_s27 = smov 0  }
   0xa   :  { %s1796_s28 = smov 0   ;;  %s1798_s29 = smov 0  }
   0xb   :  { %s1800_s30 = smov 0   ;;  %s1802_s8 = smov 0  }
   0xc   :  { %s1804_s9 = smov 0   ;;  %s1806_s6 = smov 0  }
   0xd   :  { %s1808_s10 = smov 0   ;;  %s1810_s11 = smov 0  }
   0xe   :  { %s1812_s12 = smov 0   ;;  %s1814_s13 = smov 0  }
   0xf   :  { %s1816_s14 = smov 0  }
  0x10 LB: > { %2264 = sst [smem:[#allocation16_spill]] %s1698_s29  ;;  %s1153_s15 = sadd.s32 4294967295, %s1734_s14   ;;  %s1734_s14 = sphi %s1816_s14, %s27_s14   ;;  %s1730_s13 = sphi %s1814_s13, %s2317_s13   ;;  %s1726_s12 = sphi %s1812_s12, %s2307_s12   ;;  %s1722_s11 = sphi %s1810_s11, %s2306_s11   ;;  %s1718_s10 = sphi %s1808_s10, %s2316_s10   ;;  %s1714_s6 = sphi %s1806_s6, %s2305_s6   ;;  %s1710_s9 = sphi %s1804_s9, %s2304_s9   ;;  %s1706_s8 = sphi %s1802_s8, %s2315_s8   ;;  %s1702_s30 = sphi %s1800_s30, %s2314_s30   ;;  %s1698_s29 = sphi %s1798_s29, %s2313_s29   ;;  %s1694_s28 = sphi %s1796_s28, %s2312_s28   ;;  %s1690_s27 = sphi %s1794_s27, %s2311_s27   ;;  %s1686_s26 = sphi %s1792_s26, %s2310_s26  }
  0x11   : > { %2265 = sst [smem:[#allocation17_spill]] %s1714_s6  ;;  %s1154_s16 = sadd.s32 4294967294, %s1734_s14  }
  0x12   : > { %2266 = sst [smem:[#allocation18_spill]] %s1718_s10  ;;  %p62_p0 = scmp.ne.s32.totalorder %s1706_s8, %s1702_s30 }
  0x13   : > { %2267 = sst [smem:[#allocation19_spill]] %s1722_s11  ;;  %p2249_p1 = scmp.eq.s32.totalorder %s1734_s14, 0 }
  0x14   : > { %2268 = sst [smem:[#allocation20_spill]] %s1726_s12  ;;  %p68_p2 = scmp.ne.s32.totalorder %s1702_s30, %s1698_s29 }
  0x15   : > { %p1866_p3 = scmp.eq.s32.totalorder %s1153_s15, 0  ;;  %p227_p4 = scmp.eq.s32.totalorder %s1153_s15, 7 }
  0x16   : > { %p1872_p5 = por %p2249_p1, %p62_p0  ;;  %p233_p6 = scmp.eq.s32.totalorder %s1154_s16, 7 }
  0x17   : > { %p1878_p7 = por %p1866_p3, %p68_p2  ;;  %p1882_p8 = por %p227_p4, %p62_p0 }
  0x18   : > { %p1886_p9 = por %p233_p6, %p68_p2  ;;  %p2248_p10 = scmp.lt.s32.totalorder %s1734_s14, 8 }
  0x19   : > { %s2271_s21 = scalar_select %p1878_p7, 1, 0 }
  0x1a   : > { %s2272_s22 = scalar_select %p1882_p8, 1, 0 }
  0x1b   : > { %s2274_s23 = scalar_select %p1886_p9, 1, 0 }
  0x1c   : > { %2273 = sst [smem:[#allocation21_spill]] %s2272_s22  ;;  %s268_s24 = sand.u32 1, %s1706_s8  }
  0x1d   : > { %2275 = sst [smem:[#allocation22_spill]] %s2274_s23  ;;  %s1157_s25 = sshll.u32 %s268_s24, 4 }
  0x1e   : > { %s1158_s15 = sshll.u32 %s1730_s13, 2  ;;  %s272_s16 = scalar_lea.vmem [#allocation7], %s1157_s25 }
  0x1f   : > { %s277_s18 = sadd.s32 %s1726_s12, %s1158_s15  ;;  %s280_s17 = sshll.u32 %s272_s16, 4  ;;  %s1896_s17 = int_to_ptr.vmem [resolvable:$true] %s280_s17 }
  0x20   : > { %s1159_s29 = sshll.u32 %s277_s18, 7  ;;  %s2276_s0 = sld [smem:[#allocation25_spill]] }
  0x21   : > { %p1907_p11 = pnand %p2248_p10, %p1872_p5  ;;  %s1911_s18 = scalar_lea.sflag [#allocation8], %s268_s24 }
  0x23   : > { %p1534_p13 = pneg %p1907_p11 }
  0x26   : > { %s1901_s10 = scalar_lea.hbm %s2276_s0, %s1159_s29  ;;  %s1537_s6 = scalar_lea.hbm %s2276_s0, 1024 }
  0x27   : > { %s1532_s25 = scalar_lea.hbm %s1901_s10, 256  ;;  %p1538_p4 = scmp.lt.u32.totalorder %s1901_s10, %s2276_s0 }
  0x28   : > { %p1533_p12 = scmp.ne.s32.totalorder %s1901_s10, %s1532_s25  ;;  %p1539_p5 = scmp.lt.u32.totalorder %s1537_s6, %s1532_s25 }
  0x29   : > { %p1541_p10 = scmp.lt.u32.totalorder %s1532_s25, %s1901_s10 }
  0x2a   : > { %p1535_p0 = pnand %p1534_p13, %p1533_p12  ;;  %p1540_p6 = por %p1539_p5, %p1538_p4 }
  0x2c   : > { %p1536_p2 = pneg %p1535_p0  ;;  %p1542_p1 = por %p1541_p10, %p1540_p6 }
  0x2e   : > { %p1543_p9 = pnand %p1542_p1, %p1536_p2 }
  0x30   : > { %1546 = shalt.err (!%p1543_p9)
}
  0x31   : > { %s1547_s24 = scalar_lea.vmem %s1896_s17, 256  ;;  %s1736_s7 = smov [#allocation7]  }
  0x32   : > { %p1548_p12 = scmp.ne.s32.totalorder %s1896_s17, %s1547_s24  ;;  %s1552_s29 = sshll.u32 %s1736_s7, 4  ;;  %s1553_s29 = int_to_ptr.vmem [resolvable:$false] %s1552_s29 }
  0x33   : > { %s1554_s20 = scalar_lea.vmem %s1553_s29, 512  ;;  %p1555_p7 = scmp.lt.s32.totalorder %s1896_s17, %s1553_s29 }
  0x34   : > { %p1550_p0 = pnand %p1548_p12, %p1534_p13  ;;  %p1556_p4 = scmp.lt.s32.totalorder %s1554_s20, %s1547_s24 }
  0x36   : > { %p1551_p8 = pneg %p1550_p0  ;;  %p1557_p5 = por %p1556_p4, %p1555_p7 }
  0x38   : > { %p1558_p10 = pnand %p1557_p5, %p1551_p8 }
  0x3a   : > { %1561 = shalt.err (!%p1558_p10)
}
  0x3b   : > { %s2252_s25 = smov 256   ;;  %s2253_s6 = smov 128  }
  0x3c   : > { %s2254_s16 = smov 8   ;;  %p1163_p1 = scmp.ge.s32.totalorder %s1734_s14, 1 }
  0x3d   : > { %1368 = dma.hbm_to_vmem [thread:$0]  (!%p1907_p11), %s1901_s10, 256, %s1896_s17, %s1911_s18, %s2252_s25, %s2253_s6, %s2254_s16  }
  0x3e   : > { %p310_p7 = scmp.lt.s32.totalorder %s1734_s14, 9  ;;  %s39_s29 = sadd.s32 1, %s1722_s11 }
  0x3f   : > { %p40_p9 = scmp.ge.s32.totalorder %s39_s29, 2  ;;  %p96_p13 = scmp.ne.s32.totalorder %s1690_s27, %s1686_s26 }
  0x40   : > { %p1945_p8 = pnand %p1163_p1, %p310_p7  ;;  %s2280_s10 = sadd.s32 1, %s1726_s12 }
  0x41   : > { %s2319_s29 = smov (%p40_p9, %s39_s29), 0  ;;  %s2321_s10 = smov (!%p40_p9, %s2280_s10), %s1726_s12 }
  0x42   : > { %2279 = sst [smem:[#allocation23_spill]] %s2319_s29  ;;  %s79_s17 = ssub.s32 %s1722_s11, %s2319_s29 }
  0x43   : > { %p90_p11 = scmp.ne.s32.totalorder %s1694_s28, %s1690_s27  ;;  %p44_p2 = scmp.ge.s32.totalorder %s2321_s10, 2 }
  0x44   : > { %p1964_p6 = por %p96_p13, %p1866_p3  ;;  %s290_s20 = sand.u32 1, %s1694_s28  }
  0x45   : > { %s299_s25 = sadd.s32 %s1722_s11, %s1158_s15  ;;  %s2323_s10 = smov (%p44_p2, %s2321_s10), 0 }
  0x46   : > { %s2281_s18 = scalar_select %p1964_p6, 1, 0 }
  0x47   : > { %2282 = sst [smem:[#allocation24_spill]] %s2323_s10  ;;  %s2283_s26 = sadd.s32 1, %s1730_s13 }
  0x48   : > { %s2325_s26 = smov (!%p44_p2, %s2283_s26), %s1730_s13  ;;  %s51_s6 = ssub.s32 %s1726_s12, %s2323_s10 }
  0x49   : > { %p2284_p12 = scmp.eq.s32.totalorder %s1734_s14, 0  ;;  %p48_p3 = scmp.ge.s32.totalorder %s2325_s26, 2 }
  0x4a   : > { %s1160_s19 = sshll.u32 %s290_s20, 4  ;;  %s1162_s15 = sshll.u32 %s299_s25, 7 }
  0x4b   : > { %p1981_p0 = por %p90_p11, %p2284_p12  ;;  %s2327_s26 = smov (%p48_p3, %s2325_s26), 0 }
  0x4c   : > { %s1990_s0 = scalar_lea.hbm %s2238_s1, %s1162_s15  ;;  %s50_s10 = ssub.s32 %s1730_s13, %s2327_s26 }
  0x4d   : > { %s294_s29 = scalar_lea.vmem [#allocation10], %s1160_s19  ;;  %s52_s11 = sor.u32 %s51_s6, %s50_s10 }
  0x4e   : > { %s302_s12 = sshll.u32 %s294_s29, 4  ;;  %s80_s22 = sor.u32 %s79_s17, %s50_s10  ;;  %s1994_s12 = int_to_ptr.vmem [resolvable:$true] %s302_s12 }
  0x4f   : > { %p53_p4 = scmp.eq.s32.totalorder %s52_s11, 0  ;;  %p81_p5 = scmp.eq.s32.totalorder %s80_s22, 0 }
  0x50   : > { %p2286_p10 = scmp.lt.s32.totalorder %s1734_s14, 8  ;;  %s2288_s24 = sadd.s32 1, %s1706_s8 }
  0x51   : > { %s2007_s23 = scalar_select %p53_p4, %s1706_s8, %s2288_s24  }
  0x52   : > { %p2000_p1 = pnand %p2286_p10, %p1981_p0  ;;  %s2289_s29 = sadd.s32 1, %s1694_s28 }
  0x53   : > { %s2012_s19 = scalar_select %p81_p5, %s1694_s28, %s2289_s29  }
  0x54   : > { %s2014_s6 = scalar_lea.sflag [#allocation11], %s290_s20  ;;  %s1562_s11 = scalar_lea.hbm %s1990_s0, 256 }
  0x55   : > { %p1563_p7 = scmp.ne.s32.totalorder %s1990_s0, %s1562_s11  ;;  %p1564_p9 = pneg %p2000_p1 }
  0x56   : > { %s1567_s10 = scalar_lea.hbm %s2238_s1, 1024  ;;  %p1568_p2 = scmp.lt.u32.totalorder %s1990_s0, %s2238_s1 }
  0x57   : > { %p1565_p13 = pnand %p1564_p9, %p1563_p7  ;;  %p1569_p12 = scmp.lt.u32.totalorder %s1567_s10, %s1562_s11 }
  0x58   : > { %p1571_p3 = scmp.lt.u32.totalorder %s1562_s11, %s1990_s0 }
  0x59   : > { %p1566_p11 = pneg %p1565_p13  ;;  %p1570_p0 = por %p1569_p12, %p1568_p2 }
  0x5b   : > { %p1572_p4 = por %p1571_p3, %p1570_p0 }
  0x5d   : > { %p1573_p5 = pnand %p1572_p4, %p1566_p11 }
  0x5f   : > { %1576 = shalt.err (!%p1573_p5)
}
  0x60   : > { %s1577_s20 = scalar_lea.vmem %s1994_s12, 256  ;;  %s1740_s24 = smov [#allocation10]  }
  0x61   : > { %p1578_p10 = scmp.ne.s32.totalorder %s1994_s12, %s1577_s20  ;;  %s1582_s29 = sshll.u32 %s1740_s24, 4  ;;  %s1583_s29 = int_to_ptr.vmem [resolvable:$false] %s1582_s29 }
  0x62   : > { %s1584_s22 = scalar_lea.vmem %s1583_s29, 512  ;;  %p1585_p6 = scmp.lt.s32.totalorder %s1994_s12, %s1583_s29 }
  0x63   : > { %p1580_p7 = pnand %p1578_p10, %p1564_p9  ;;  %p1586_p2 = scmp.lt.s32.totalorder %s1584_s22, %s1577_s20 }
  0x65   : > { %p1581_p13 = pneg %p1580_p7  ;;  %p1587_p12 = por %p1586_p2, %p1585_p6 }
  0x67   : > { %p1588_p0 = pnand %p1587_p12, %p1581_p13 }
  0x69   : > { %1591 = shalt.err (!%p1588_p0)
}
  0x6a   : > { %s2290_s11 = smov 8   ;;  %s2291_s16 = smov 128  }
  0x6b   : > { %s2292_s10 = smov 256   ;;  %314 = sbr.rel (%p1945_p8) target bundleno = 1079 (0x437), region = 48 }
  0x6c   : > { %1371 = dma.hbm_to_vmem [thread:$0]  (!%p2000_p1), %s1990_s0, 256, %s1994_s12, %s2014_s6, %s2292_s10, %s2291_s16, %s2290_s11  }
  0x6d   : > { %s2048_s17 = sand.u32 (!%p1945_p8), 1, %s1702_s30   ;;  %p2293_p6 = scmp.ne.s32.totalorder (!%p1945_p8), %s2271_s21, 0 }
  0x6e   : > { %s1164_s15 = sshll.u32 (!%p1945_p8), %s2048_s17, 4  ;;  %s317_s20 = scalar_lea.sflag (!%p1945_p8), [#allocation8], %s2048_s17 }
  0x6f   : > { %s2052_s24 = scalar_lea.vmem (!%p1945_p8), [#allocation7], %s1164_s15 }
  0x72   : > { %1673 = dma.done.wait (%p2293_p6), %s317_s20, 256  }
  0x73   : > { %1675 = vsyncadd (%p2293_p6), %s317_s20, 4294967040  ;;  %s325_s0 = sand.u32 1, %s1690_s27   ;;  %p2294_p8 = scmp.ne.s32.totalorder %s2281_s18, 0 }
  0x74   : > { %s2059_s12 = sshll.u32 %s325_s0, 4  ;;  %s326_s7 = scalar_lea.sflag [#allocation11], %s325_s0 }
  0x75   : > { %s329_s25 = scalar_lea.vmem [#allocation10], %s2059_s12 }
  0x76   : > { %1677 = dma.done.wait (%p2294_p8), %s326_s7, 256  }
  0x77   : > { %1679 = vsyncadd (%p2294_p8), %s326_s7, 4294967040  ;;  %s2066_s6 = scalar_lea.vmem [#allocation12], %s1164_s15  ;;  %p1167_p1 = scmp.ne.s32.totalorder %s1710_s9, 0 }
  0x78   : > { %v369_v0 = vld [vmem:[%s2052_s24] sm:$0xff] (!%p1167_p1)  ;;  %v370_v1 = vld [vmem:[%s2052_s24 + $0x8] sm:$0xff] (!%p1167_p1)  ;;  %vm385_vm0 = vcmask (!%p1167_p1), 130048   ;;  %v1741_v4 = vmov (!%p1167_p1), 0   ;;  %v1742_v8 = vmov (!%p1167_p1), 0.0   ;;  %v1743_v9 = vmov (!%p1167_p1), -inf  }
  0x79   : > { %368 = sbr.rel (%p1167_p1) target bundleno = 343 (0x157), region = 60  ;;  %v371_v2 = vld [vmem:[%s2239_s2] sm:$0xff] (!%p1167_p1)  ;;  %v1315_v3 = vpack.c.bf16 (!%p1167_p1), %v370_v1, %v369_v0  ;;  %1493 = vset.pattern.permute.xlu0 (!%p1167_p1), %v1741_v4  ;;  %v374_v6 = vld [vmem:[%s2240_s3 + $0x8] sm:$0xff] (!%p1167_p1)  ;;  %469 = vst [vmem:[#allocation3] sm:$0xff] (!%p1167_p1), %v1742_v8  ;;  %470 = vst [vmem:[#allocation3 + $0x8] sm:$0xff] (!%p1167_p1), %v1742_v8 }
  0x7a   : > { %1242 = vmatprep.mubr.msk.f32.mxu0 (!%p1167_p1), %vm385_vm0, %v371_v2  ;;  %v373_v5 = vld [vmem:[%s2240_s3] sm:$0xff] (!%p1167_p1)  ;;  %v372_v7 = vld [vmem:[%s2239_s2 + $0x8] sm:$0xff] (!%p1167_p1)  ;;  %471 = vst [vmem:[#allocation4] sm:$0x1] (!%p1167_p1), %v1743_v9  ;;  %472 = vst [vmem:[#allocation5] sm:$0x1] (!%p1167_p1), %v1742_v8 }
  0x7b   : > { %377 = vperm.xlu0 (!%p1167_p1), %1493, %v373_v5   ;;  %1316 = vmatprep.subr.bf16.mxu0 (!%p1167_p1), %v1315_v3 }
  0x7c   : > { %1318 = vmatpush3.bf16.msra.mxu0 (!%p1167_p1), %v1315_v3 }
  0x7f   : > { %382 = vperm.xlu0 (!%p1167_p1), %1493, %v374_v6   ;;  %1243 = vmatmul.mubr.msk.f32.vlgmr.msra.gmra.mrb[0].mxu0 (!%p1167_p1), %vm385_vm0, %v372_v7 }
  0xfa   : > { %v378_v10 = vpop.permute.xlu0 %377 }
  0xfe   : > { %v383_v11 = vpop.permute.xlu0 %382 }
 0x152   : > { %v1244_v12 = vpop.f32.mrb[0].mxu0 }
 0x153   : > { %v464_v13 = vadd.f32 %v1244_v12, %v383_v11  ;;  %v458_v14 = vpop.f32.mrb[1].mxu0 }
 0x154   : > { %v459_v15 = vadd.f32 %v458_v14, %v378_v10 }
 0x155   : > { %468 = vst [vmem:[#allocation2 + $0x8] sm:$0xff] %v464_v13 }
 0x156   : > { %467 = vst [vmem:[#allocation2] sm:$0xff] %v459_v15 }
 0x157 PF: > { %v473_v16 = vld [vmem:[%s329_s25] sm:$0xff]  ;;  %v474_v19 = vld [vmem:[%s329_s25 + $0x8] sm:$0xff]  ;;  %vm509_vm1 = vcmask 130048   ;;  %v1744_v24 = vmov 0   ;;  %p1188_p9 = scmp.ne.s32.totalorder %s1710_s9, 1 }
 0x158   : > { %477 = vxpose.xlu0.b32.start [1/2] (short) %v473_v16, 128  ;;  %v1323_v21 = vpack.c.bf16 %v474_v19, %v473_v16  ;;  %v809_v22 = vld [vmem:[%s2241_s4] sm:$0xff]  ;;  %1494 = vset.pattern.permute.xlu1 %v1744_v24  ;;  %v810_v25 = vld [vmem:[%s2241_s4 + $0x8] sm:$0xff]  ;;  %v730_v16 = vlaneseq  ;;  %s999_s22 = sld [smem:[#allocation6]] (!%p1188_p9) }
 0x159   : > { %v811_v23 = vld [vmem:[%s2242_s5] sm:$0xff]  ;;  %1277 = vmatprep.mubr.msk.f32.mxu1 %vm509_vm1, %v809_v22  ;;  %v812_v26 = vld [vmem:[%s2242_s5 + $0x8] sm:$0xff] }
 0x15a   : > { %1324 = vmatprep.subr.bf16.mxu1 %v1323_v21  ;;  %815 = vperm.xlu1 %1494, %v811_v23  }
 0x15b   : > { %1326 = vmatpush3.bf16.msra.mxu1 %v1323_v21  ;;  %v703_v21 = vld [vmem:[#allocation4] sm:$0x1] }
 0x15c   : > { %v476_v18 = vld [vmem:[#allocation2 + $0x8] sm:$0xff]  ;;  %478 = vxpose.xlu0.b32.end [2/2] (short) %v474_v19, 128  ;;  %v731_v19 = vshrl.u32 %v730_v16, 7 }
 0x15d   : > { %v475_v17 = vld [vmem:[#allocation2] sm:$0xff] }
 0x15e   : > { %v1319_v20 = vpack.c.bf16 %v476_v18, %v475_v17  ;;  %1278 = vmatmul.mubr.msk.f32.vlgmr.msra.gmra.mrb[0].mxu1 %vm509_vm1, %v810_v25  ;;  %820 = vperm.xlu1 %1494, %v812_v26   ;;  %v2137_v23 = vsub.s32 0, %v731_v19 }
 0x160   : > { %1320 = vmatprep.subr.bf16.mxu0 %v1319_v20 }
 0x161   : > { %1322 = vmatpush3.bf16.msra.mxu0 %v1319_v20 }
 0x185   : > { %1495 = vset.pattern.permute.xlu0 %v1744_v24 }
 0x1d8   : > { %v493_v27 = vpop.trf.xlu0 }
 0x1d9   : > { %1249 = vmatprep.mubr.msk.f32.mxu0 %vm509_vm1, %v493_v27  ;;  %v816_v44 = vpop.permute.xlu1 %815 }
 0x1dc   : > { %v494_v28 = vpop.trf.xlu0 }
 0x1dd   : > { %1250 = vmatmul.mubr.msk.f32.vlgmr.msra.gmra.mrb[0].mxu0 %vm509_vm1, %v494_v28 }
 0x1e0   : > { %v495_v29 = vpop.trf.xlu0 }
 0x1e1   : > { %1252 = vmatprep.mubr.msk.f32.mxu0 %vm509_vm1, %v495_v29 }
 0x1e4   : > { %v496_v30 = vpop.trf.xlu0 }
 0x1e5   : > { %1253 = vmatmul.mubr.msk.f32.gmra.mrb[2].mxu0 %vm509_vm1, %v496_v30 }
 0x1e8   : > { %v497_v31 = vpop.trf.xlu0 }
 0x1e9   : > { %1255 = vmatprep.mubr.msk.f32.mxu0 %vm509_vm1, %v497_v31 }
 0x1ec   : > { %v498_v32 = vpop.trf.xlu0 }
 0x1ed   : > { %1256 = vmatmul.mubr.msk.f32.gmra.mrb[4].mxu0 %vm509_vm1, %v498_v32 }
 0x1f0   : > { %v499_v33 = vpop.trf.xlu0 }
 0x1f1   : > { %1258 = vmatprep.mubr.msk.f32.mxu0 %vm509_vm1, %v499_v33 }
 0x1f4   : > { %v500_v34 = vpop.trf.xlu0 }
 0x1f5   : > { %1259 = vmatmul.mubr.msk.f32.gmra.mrb[6].mxu0 %vm509_vm1, %v500_v34 }
 0x1f8   : > { %v501_v35 = vpop.trf.xlu0 }
 0x1f9   : > { %1261 = vmatprep.mubr.msk.f32.mxu0 %vm509_vm1, %v501_v35 }
 0x1fc   : > { %v502_v36 = vpop.trf.xlu0 }
 0x1fd   : > { %1262 = vmatmul.mubr.msk.f32.gmra.mrb[8].mxu0 %vm509_vm1, %v502_v36 }
 0x200   : > { %v503_v37 = vpop.trf.xlu0 }
 0x201   : > { %1264 = vmatprep.mubr.msk.f32.mxu0 %vm509_vm1, %v503_v37 }
 0x204   : > { %v504_v38 = vpop.trf.xlu0 }
 0x205   : > { %1265 = vmatmul.mubr.msk.f32.gmra.mrb[10].mxu0 %vm509_vm1, %v504_v38 }
 0x208   : > { %v505_v39 = vpop.trf.xlu0 }
 0x209   : > { %1267 = vmatprep.mubr.msk.f32.mxu0 %vm509_vm1, %v505_v39 }
 0x20c   : > { %v506_v40 = vpop.trf.xlu0 }
 0x20d   : > { %1268 = vmatmul.mubr.msk.f32.gmra.mrb[12].mxu0 %vm509_vm1, %v506_v40 }
 0x210   : > { %v507_v41 = vpop.trf.xlu0 }
 0x211   : > { %1270 = vmatprep.mubr.msk.f32.mxu0 %vm509_vm1, %v507_v41 }
 0x214   : > { %v508_v42 = vpop.trf.xlu0 }
 0x215   : > { %1271 = vmatmul.mubr.msk.f32.gmra.mrb[14].mxu0 %vm509_vm1, %v508_v42 }
 0x231   : > { %v2117_v43 = vpop.f32.mrb[0].mxu1 }
 0x232   : > { %v895_v45 = vpop.f32.mrb[1].mxu1 }
 0x233   : > { %v896_v46 = vadd.f32 %v895_v45, %v816_v44 }
 0x235   : > { %1312 = vmatprep.mubr.f32.mxu0 %v896_v46 }
 0x2b0   : > { %v1251_v47 = vpop.f32.mrb[0].mxu0 }
 0x2b1   : > { %v624_v48 = vpop.f32.mrb[1].mxu0 }
 0x2b8   : > { %v1254_v49 = vpop.f32.mrb[2].mxu0 }
 0x2b9   : > { %v634_v50 = vpop.f32.mrb[3].mxu0 }
 0x2c0   : > { %v2119_v51 = vpop.f32.mrb[4].mxu0 }
 0x2c1   : > { %v705_v52 = vmax.f32 %v1251_v47, %v2119_v51  ;;  %v644_v53 = vpop.f32.mrb[5].mxu0 }
 0x2c2   : > { %v704_v54 = vmax.f32 %v624_v48, %v644_v53 }
 0x2c8   : > { %v2122_v55 = vpop.f32.mrb[6].mxu0 }
 0x2c9   : > { %v707_v56 = vmax.f32 %v1254_v49, %v2122_v55  ;;  %v654_v57 = vpop.f32.mrb[7].mxu0 }
 0x2ca   : > { %v706_v58 = vmax.f32 %v634_v50, %v654_v57 }
 0x2d0   : > { %v2125_v59 = vpop.f32.mrb[8].mxu0 }
 0x2d1   : > { %v709_v60 = vmax.f32 %v705_v52, %v2125_v59  ;;  %v664_v61 = vpop.f32.mrb[9].mxu0 }
 0x2d2   : > { %v708_v62 = vmax.f32 %v704_v54, %v664_v61 }
 0x2d8   : > { %v2128_v63 = vpop.f32.mrb[10].mxu0 }
 0x2d9   : > { %v711_v0 = vmax.f32 %v707_v56, %v2128_v63  ;;  %v674_v1 = vpop.f32.mrb[11].mxu0 }
 0x2da   : > { %v710_v2 = vmax.f32 %v706_v58, %v674_v1 }
 0x2e0   : > { %v2131_v3 = vpop.f32.mrb[12].mxu0 }
 0x2e1   : > { %v713_v4 = vmax.f32 %v709_v60, %v2131_v3  ;;  %v684_v5 = vpop.f32.mrb[13].mxu0 }
 0x2e2   : > { %v712_v6 = vmax.f32 %v708_v62, %v684_v5 }
 0x2e4   : > { %v716_v7 = vmax.f32 %v712_v6, %v713_v4 }
 0x2e8   : > { %v2134_v8 = vpop.f32.mrb[14].mxu0 }
 0x2e9   : > { %v715_v9 = vmax.f32 %v711_v0, %v2134_v8  ;;  %v694_v10 = vpop.f32.mrb[15].mxu0 }
 0x2ea   : > { %v714_v11 = vmax.f32 %v710_v2, %v694_v10 }
 0x2ec   : > { %v717_v12 = vmax.f32 %v714_v11, %v715_v9 }
 0x2ee   : > { %v718_v13 = vmax.f32 %v716_v7, %v717_v12 }
 0x2f0   : > { %v719_v14 = vrot.slane %v718_v13, 4 }
 0x2f2   : > { %v720_v15 = vmax.f32 %v718_v13, %v719_v14 }
 0x2f4   : > { %v721_v17 = vrot.slane %v720_v15, 2 }
 0x2f6   : > { %v722_v18 = vmax.f32 %v720_v15, %v721_v17 }
 0x2f8   : > { %v723_v20 = vrot.slane %v722_v18, 1 }
 0x2fa   : > { %v724_v22 = vmax.f32 %v722_v18, %v723_v20 }
 0x2fc   : > { %v725_v24 = vmax.f32 %v703_v21, %v724_v22 }
 0x2fe   : > { %v733_v25 = vrot.slane %v725_v24, %v2137_v23  ;;  %808 = vst [vmem:[#allocation4] sm:$0x1] %v725_v24  ;;  %v726_v56 = vsub.f32 %v703_v21, %v725_v24 }
 0x300   : > { %v735_v26 = vsub.f32 %v624_v48, %v733_v25  ;;  %v736_v27 = vsub.f32 %v1251_v47, %v733_v25  ;;  %v737_v28 = vsub.f32 %v634_v50, %v733_v25  ;;  %v738_v29 = vsub.f32 %v1254_v49, %v733_v25 }
 0x301   : > { %v739_v30 = vsub.f32 %v644_v53, %v733_v25  ;;  %v740_v31 = vsub.f32 %v2119_v51, %v733_v25  ;;  %v741_v32 = vsub.f32 %v654_v57, %v733_v25  ;;  %v742_v33 = vsub.f32 %v2122_v55, %v733_v25 }
 0x302   : > { %v743_v34 = vsub.f32 %v664_v61, %v733_v25  ;;  %v744_v35 = vsub.f32 %v2125_v59, %v733_v25  ;;  %v745_v36 = vsub.f32 %v674_v1, %v733_v25  ;;  %v746_v37 = vsub.f32 %v2128_v63, %v733_v25 }
 0x303   : > { %v747_v38 = vsub.f32 %v684_v5, %v733_v25  ;;  %v748_v39 = vsub.f32 %v2131_v3, %v733_v25  ;;  %v749_v40 = vsub.f32 %v694_v10, %v733_v25  ;;  %v751_v41 = vmul.f32 1.442695, %v735_v26 }
 0x304   : > { %v753_v42 = vmul.f32 1.442695, %v736_v27  ;;  %v755_v44 = vmul.f32 1.442695, %v737_v28  ;;  %v757_v45 = vmul.f32 1.442695, %v738_v29  ;;  %v750_v46 = vsub.f32 %v2134_v8, %v733_v25 }
 0x305   : > { %1496 = vpow2.f32 %v751_v41  ;;  %v759_v47 = vmul.f32 1.442695, %v739_v30  ;;  %v761_v48 = vmul.f32 1.442695, %v740_v31  ;;  %v763_v49 = vmul.f32 1.442695, %v741_v32 }
 0x306   : > { %1498 = vpow2.f32 %v753_v42  ;;  %v765_v50 = vmul.f32 1.442695, %v742_v33  ;;  %v767_v51 = vmul.f32 1.442695, %v743_v34  ;;  %v769_v52 = vmul.f32 1.442695, %v744_v35 }
 0x307   : > { %1500 = vpow2.f32 %v755_v44  ;;  %v771_v53 = vmul.f32 1.442695, %v745_v36  ;;  %v773_v54 = vmul.f32 1.442695, %v746_v37  ;;  %v775_v55 = vmul.f32 1.442695, %v747_v38 }
 0x308   : > { %1502 = vpow2.f32 %v757_v45  ;;  %v777_v57 = vmul.f32 1.442695, %v748_v39  ;;  %v779_v59 = vmul.f32 1.442695, %v749_v40  ;;  %v781_v61 = vmul.f32 1.442695, %v750_v46  ;;  %v821_v39 = vpop.permute.xlu1 %820 }
 0x309   : > { %1504 = vpow2.f32 %v759_v47  ;;  %v727_v1 = vmul.f32 1.442695, %v726_v56  ;;  %v901_v41 = vadd.f32 %v2117_v43, %v821_v39  ;;  %v783_v46 = vld [vmem:[#allocation5] sm:$0x1] }
 0x30a   : > { %1506 = vpow2.f32 %v761_v48 }
 0x30b   : > { %1508 = vpow2.f32 %v763_v49 }
 0x30c   : > { %1510 = vpow2.f32 %v765_v50 }
 0x30d   : > { %1512 = vpow2.f32 %v767_v51  ;;  %v980_v51 = vld [vmem:[#allocation3 + $0x8] sm:$0xff] }
 0x30e   : > { %1514 = vpow2.f32 %v769_v52  ;;  %v979_v52 = vld [vmem:[#allocation3] sm:$0xff] }
 0x30f   : > { %v1497_v58 = vpop.eup %1496  ;;  %1516 = vpow2.f32 %v771_v53 }
 0x310   : > { %v1499_v60 = vpop.eup %1498  ;;  %1518 = vpow2.f32 %v773_v54 }
 0x311   : > { %v1501_v62 = vpop.eup %1500  ;;  %1520 = vpow2.f32 %v775_v55  ;;  %v785_v63 = vadd.f32 %v1499_v60, %v1497_v58  ;;  %v1327_v0 = vpack.c.bf16 %v1499_v60, %v1497_v58 }
 0x312   : > { %v1503_v2 = vpop.eup %1502  ;;  %1522 = vpow2.f32 %v777_v57 }
 0x313   : > { %v1505_v3 = vpop.eup %1504  ;;  %1524 = vpow2.f32 %v779_v59  ;;  %v786_v4 = vadd.f32 %v1501_v62, %v785_v63  ;;  %1328 = vmatprep.subr.bf16.mxu0 %v1327_v0  ;;  %v1331_v5 = vpack.c.bf16 %v1503_v2, %v1501_v62  ;;  %v1010_v63 = vstv (!%p1188_p9), %s999_s22 }
 0x314   : > { %v1507_v6 = vpop.eup %1506  ;;  %1330 = vmatpush3.bf16.msra.mxu0 %v1327_v0  ;;  %1526 = vpow2.f32 %v781_v61 }
 0x315   : > { %v1509_v7 = vpop.eup %1508  ;;  %v787_v8 = vadd.f32 %v1503_v2, %v786_v4  ;;  %1332 = vmatprep.subr.bf16.mxu0 %v1331_v5  ;;  %v1335_v9 = vpack.c.bf16 %v1507_v6, %v1505_v3  ;;  %1528 = vpow2.f32 %v727_v1  ;;  %v1013_v2 = vld [vmem:[%s2052_s24] sm:$0xff] (!%p1188_p9) }
 0x316   : > { %v1511_v10 = vpop.eup %1510 }
 0x317   : > { %v1513_v11 = vpop.eup %1512  ;;  %v788_v12 = vadd.f32 %v1505_v3, %v787_v8  ;;  %v1339_v13 = vpack.c.bf16 %v1511_v10, %v1509_v7  ;;  %v1014_v3 = vld [vmem:[%s2052_s24 + $0x8] sm:$0xff] (!%p1188_p9) }
 0x318   : > { %v1515_v14 = vpop.eup %1514  ;;  %1334 = vmatpush3.bf16.msra.mxu0 %v1331_v5 }
 0x319   : > { %v1517_v15 = vpop.eup %1516  ;;  %v789_v16 = vadd.f32 %v1507_v6, %v788_v12  ;;  %1336 = vmatprep.subr.bf16.mxu0 %v1335_v9  ;;  %v1343_v17 = vpack.c.bf16 %v1515_v14, %v1513_v11 }
 0x31a   : > { %v1519_v18 = vpop.eup %1518 }
 0x31b   : > { %v1521_v19 = vpop.eup %1520  ;;  %v790_v20 = vadd.f32 %v1509_v7, %v789_v16  ;;  %v1347_v21 = vpack.c.bf16 %v1519_v18, %v1517_v15 }
 0x31c   : > { %v1523_v22 = vpop.eup %1522  ;;  %1338 = vmatpush3.bf16.msra.mxu0 %v1335_v9 }
 0x31d   : > { %v1525_v24 = vpop.eup %1524  ;;  %v791_v25 = vadd.f32 %v1511_v10, %v790_v20  ;;  %1340 = vmatprep.subr.bf16.mxu0 %v1339_v13  ;;  %v1351_v26 = vpack.c.bf16 %v1523_v22, %v1521_v19 }
 0x31e   : > { %v1527_v27 = vpop.eup %1526 }
 0x31f   : > { %v1529_v28 = vpop.eup %1528  ;;  %v792_v29 = vadd.f32 %v1513_v11, %v791_v25  ;;  %v1355_v30 = vpack.c.bf16 %v1527_v27, %v1525_v24 }
 0x320   : > { %1342 = vmatpush3.bf16.msra.mxu0 %v1339_v13  ;;  %v985_v31 = vrot.slane %v1529_v28, %v2137_v23  ;;  %v784_v49 = vmul.f32 %v1529_v28, %v783_v46 }
 0x321   : > { %v793_v32 = vadd.f32 %v1515_v14, %v792_v29  ;;  %1344 = vmatprep.subr.bf16.mxu0 %v1343_v17 }
 0x322   : > { %v988_v53 = vmul.f32 %v985_v31, %v980_v51  ;;  %v987_v55 = vmul.f32 %v985_v31, %v979_v52 }
 0x323   : > { %v794_v33 = vadd.f32 %v1517_v15, %v793_v32 }
 0x324   : > { %1346 = vmatpush3.bf16.msra.mxu0 %v1343_v17 }
 0x325   : > { %v795_v34 = vadd.f32 %v1519_v18, %v794_v33  ;;  %1348 = vmatprep.subr.bf16.mxu0 %v1347_v21 }
 0x327   : > { %v796_v35 = vadd.f32 %v1521_v19, %v795_v34 }
 0x328   : > { %1350 = vmatpush3.bf16.msra.mxu0 %v1347_v21 }
 0x329   : > { %v797_v36 = vadd.f32 %v1523_v22, %v796_v35  ;;  %1352 = vmatprep.subr.bf16.mxu0 %v1351_v26 }
 0x32b   : > { %v798_v37 = vadd.f32 %v1525_v24, %v797_v36 }
 0x32c   : > { %1354 = vmatpush3.bf16.msra.mxu0 %v1351_v26 }
 0x32d   : > { %v799_v38 = vadd.f32 %v1527_v27, %v798_v37  ;;  %1356 = vmatprep.subr.bf16.mxu0 %v1355_v30 }
 0x32f   : > { %v800_v40 = vrot.slane %v799_v38, 4 }
 0x330   : > { %1358 = vmatpush3.bf16.msra.mxu0 %v1355_v30 }
 0x331   : > { %v801_v42 = vadd.f32 %v800_v40, %v799_v38 }
 0x333   : > { %v802_v44 = vrot.slane %v801_v42, 2  ;;  %1313 = vmatmul.mubr.f32.vlgmr.msra.gmra.mrb[16].mxu0 %v901_v41 }
 0x335   : > { %v803_v45 = vadd.f32 %v802_v44, %v801_v42 }
 0x337   : > { %v804_v47 = vrot.slane %v803_v45, 1 }
 0x339   : > { %v805_v48 = vadd.f32 %v804_v47, %v803_v45 }
 0x33b   : > { %v806_v50 = vadd.f32 %v805_v48, %v784_v49 }
 0x33d   : > { %807 = vst [vmem:[#allocation5] sm:$0x1] %v806_v50 }
 0x344   : > { %v997_v43 = vld [vmem:[#allocation5] sm:$0x1] (!%p1188_p9) }
 0x345   : > { %1530 = vrcp.f32 (!%p1188_p9), %v997_v43 }
 0x34f   : > { %v1531_v59 = vpop.eup (!%p1188_p9), %1530 }
 0x350   : > { %v1006_v62 = vrot.slane (!%p1188_p9), %v1531_v59, %v2137_v23 }
 0x404   : > { %996 = sbr.rel (%p1188_p9) target bundleno = 1049 (0x419), region = 64 }
 0x406   : > { %v1314_v54 = vpop.f32.mrb[16].mxu0 }
 0x407   : > { %v990_v56 = vadd.f32 %v1314_v54, %v988_v53  ;;  %v970_v57 = vpop.f32.mrb[17].mxu0 }
 0x408   : > { %v989_v58 = vadd.f32 %v987_v55, %v970_v57 }
 0x409   : > { %992 = vst [vmem:[#allocation3 + $0x8] sm:$0xff] %v990_v56 }
 0x40a   : > { %991 = vst [vmem:[#allocation3] sm:$0xff] %v989_v58 }
 0x410   : > { %v1001_v61 = vld [vmem:[#allocation3 + $0x8] sm:$0xff] }
 0x411   : > { %v1000_v60 = vld [vmem:[#allocation3] sm:$0xff]  ;;  %v1009_v1 = vmul.f32 %v1006_v62, %v1001_v61 }
 0x412   : > { %v1008_v0 = vmul.f32 %v1006_v62, %v1000_v60 }
 0x413   : > { %v1012_v5 = vmul.f32 %v1010_v63, %v1009_v1 }
 0x414   : > { %v1011_v4 = vmul.f32 %v1010_v63, %v1008_v0 }
 0x415   : > { %v1016_v7 = vadd.f32 %v1014_v3, %v1012_v5 }
 0x416   : > { %v1015_v6 = vadd.f32 %v1013_v2, %v1011_v4 }
 0x417   : > { %1018 = vst [vmem:[%s2066_s6 + $0x8] sm:$0xff] %v1016_v7 }
 0x418   : > { %1017 = vst [vmem:[%s2066_s6] sm:$0xff] %v1015_v6 }
 0x419 PF: > { %s2295_s9 = sld [smem:[#allocation18_spill]]  ;;  %s2296_s11 = sld [smem:[#allocation17_spill]] }
 0x41a   : > { %s2297_s16 = sld [smem:[#allocation21_spill]]  ;;  %s1034_s20 = sshll.u32 %s2066_s6, 4  ;;  %s2157_s20 = int_to_ptr.vmem [resolvable:$true] %s1034_s20 }
 0x41b   : > { %s2298_s21 = sld [smem:[#allocation26_spill]]  ;;  %s1020_s25 = scalar_lea.sflag [#allocation9], %s2048_s17 }
 0x41c   : > { %s1592_s29 = scalar_lea.vmem %s2157_s20, 256  ;;  %s1745_s18 = smov [#allocation12]  }
 0x41d   : > { %p1593_p11 = scmp.ne.s32.totalorder %s2157_s20, %s1592_s29  ;;  %s1596_s22 = sshll.u32 %s1745_s18, 4  ;;  %s1597_s22 = int_to_ptr.vmem [resolvable:$false] %s1596_s22 }
 0x41e   : > { %s1598_s6 = scalar_lea.vmem %s1597_s22, 512  ;;  %p1599_p10 = scmp.lt.s32.totalorder %s2157_s20, %s1597_s22 }
 0x41f   : > { %s1190_s10 = sshll.u32 %s2295_s9, 2  ;;  %p1600_p7 = scmp.lt.s32.totalorder %s1598_s6, %s1592_s29 }
 0x420   : > { %s1031_s15 = sadd.s32 %s2296_s11, %s1190_s10  ;;  %p2299_p3 = scmp.ne.s32.totalorder %s2297_s16, 0 }
 0x421   : > { %s1191_s0 = sshll.u32 %s1031_s15, 7  ;;  %p1601_p13 = por %p1600_p7, %p1599_p10 }
 0x422   : > { %s2162_s12 = scalar_lea.hbm %s2298_s21, %s1191_s0  ;;  %p1594_p4 = pnand %p1593_p11, %p2299_p3 }
 0x424   : > { %p1595_p5 = pneg %p1594_p4 }
 0x426   : > { %p1602_p2 = pnand %p1601_p13, %p1595_p5 }
 0x428   : > { %1605 = shalt.err (!%p1602_p2)
}
 0x429   : > { %s1606_s9 = scalar_lea.hbm %s2162_s12, 256  ;;  %s1610_s15 = scalar_lea.hbm %s2298_s21, 1024 }
 0x42a   : > { %p1607_p12 = scmp.ne.s32.totalorder %s2162_s12, %s1606_s9  ;;  %p1611_p8 = scmp.lt.u32.totalorder %s2162_s12, %s2298_s21 }
 0x42b   : > { %p1612_p1 = scmp.lt.u32.totalorder %s1610_s15, %s1606_s9  ;;  %p1614_p11 = scmp.lt.u32.totalorder %s1606_s9, %s2162_s12 }
 0x42c   : > { %p1608_p0 = pnand %p1607_p12, %p2299_p3 }
 0x42d   : > { %p1613_p9 = por %p1612_p1, %p1611_p8 }
 0x42e   : > { %p1609_p6 = pneg %p1608_p0 }
 0x42f   : > { %p1615_p4 = por %p1614_p11, %p1613_p9 }
 0x431   : > { %p1616_p5 = pnand %p1615_p4, %p1609_p6 }
 0x433   : > { %1619 = shalt.err (!%p1616_p5)
}
 0x434   : > { %s1746_s24 = smov 128   ;;  %s1747_s29 = smov 256  }
 0x435   : > { %s1748_s18 = smov 8  }
 0x436   : > { %1363 = dma.vmem_to_hbm [thread:$0]  (%p2299_p3), %s2157_s20, 256, %s2162_s12, %s1020_s25, %s1746_s24, %s1747_s29, %s1748_s18  }
 0x437 PF: > { %s2300_s22 = sld [smem:[#allocation16_spill]]  ;;  %s2301_s6 = sld [smem:[#allocation22_spill]] }
 0x438   : > { %p1377_p10 = scmp.ge.s32.totalorder %s1734_s14, 2 }
 0x43d   : > { %s1049_s11 = sand.u32 1, %s2300_s22   ;;  %p2302_p7 = scmp.ne.s32.totalorder %s2301_s6, 0 }
 0x43e   : > { %s1050_s9 = scalar_lea.sflag [#allocation9], %s1049_s11 }
 0x43f   : > { %p1373_p13 = pnand %p1377_p10, %p2302_p7 }
 0x441   : > { %1681 = dma.done.wait (!%p1373_p13), %s1050_s9, 256  }
 0x442   : > { %1683 = vsyncadd (!%p1373_p13), %s1050_s9, 4294967040  ;;  %s27_s14 = sadd.s32 1, %s1734_s14   ;;  %s2304_s9 = sld [smem:[#allocation19_spill]] }
 0x443   : > { %p2193_p2 = scmp.ge.s32.totalorder %s27_s14, 10   ;;  %s2305_s6 = sld [smem:[#allocation20_spill]] }
 0x444   : > { %s2306_s11 = sld [smem:[#allocation23_spill]]  ;;  %s2307_s12 = sld [smem:[#allocation24_spill]] }
 0x445   : > { %s2308_s17 = smov %s2327_s26  ;;  %s2310_s26 = smov %s1690_s27 }
 0x446   : > { %s2311_s27 = smov %s1694_s28  ;;  %s2312_s28 = smov %s2012_s19 }
 0x447   : > { %s2313_s29 = smov %s1702_s30  ;;  %s2314_s30 = smov %s1706_s8 }
 0x448   : > { %s2315_s8 = smov %s2007_s23  ;;  %s2316_s10 = smov %s1730_s13 }
 0x449   : > { %s2317_s13 = smov %s2308_s17  ;;  %26 = sbr.rel (!%p2193_p2) target bundleno = 16 (0x10), region = 114 }
 0x450   :  { %1055 = vsyncpa [#allocation8], 1 }
 0x451   :  { %1057 = vsyncpa [#allocation8 + $0x1], 1 }
 0x452   :  { %1058 = vsyncpa [#allocation11], 1 }
 0x453   :  { %1060 = vsyncpa [#allocation11 + $0x1], 1 }
 0x454   :  { %1061 = vsyncpa [#allocation9], 1 }
 0x455   :  { %1063 = vsyncpa [#allocation9 + $0x1], 1 }

</bundles_post_ra>
